<compile_context>
chip_gen: v6e
topology: v6e:2x2x1
jax: 0.10.0
libtpu: 0.0.40
codegen_flags: <defaults>
</compile_context>

<pallas_src>
import functools
import math

import jax
import jax.numpy as jnp
from jax.experimental import pallas as pl
from jax.experimental.pallas import tpu as pltpu


_LANE = 128


def _round_up(x, m):
    return (x + m - 1) // m * m


def _sublane_multiple(dtype) -> int:
    # (8,128) vreg tiles hold 32-bit elements; narrower dtypes pack sublanes.
    return max(8, 32 // jnp.dtype(dtype).itemsize)


def _vmem_capacity_bytes() -> int:
    """Physical VMEM of the local chip; conservative (v7x-sized) fallback."""
    try:
        info = pltpu.get_tpu_info()
        cap = int(getattr(info, "vmem_capacity_bytes", 0) or 0)
        if cap > 0:
            return cap
    except Exception:
        pass
    return 64 * 1024 * 1024


def _pick_row_block(n_rows, w, s, dtype, *, vmem_budget, max_rows=2048):
    """Largest row block T that (a) divides n_rows, (b) matches the dtype's
    sublane packing, (c) keeps the double-buffered in+out blocks under the
    VMEM budget, and (d) leaves >= 4 grid blocks when possible (>= 2 per
    TensorCore on v7x)."""
    m = _sublane_multiple(dtype)
    itemsize = jnp.dtype(dtype).itemsize
    # Padded VMEM bytes per row: (T, W) input block + (T, s*s*W) output block,
    # each double-buffered by the BlockSpec pipeline.
    row_bytes = (_round_up(w, _LANE) + _round_up(s * s * w, _LANE)) * itemsize
    cap = max(m, min(n_rows, max_rows, vmem_budget // (2 * row_bytes)))

    def choose(cands):
        if not cands:
            return None
        for min_blocks in (4, 2):
            ok = [t for t in cands if n_rows // t >= min_blocks]
            if ok:
                return max(ok)
        return max(cands)

    aligned = [t for t in range(m, cap + 1, m) if n_rows % t == 0]
    t = choose(aligned)
    if t is None:
        # Awkward n_rows (e.g. odd H with tiny B*C): fall back to any divisor
        # <= cap so a single block can never exceed the VMEM budget.
        t = choose([d for d in range(1, cap + 1) if n_rows % d == 0])
    return t


def _pick_row_chunk(t_rows, w, s, dtype, *, target_elems=8192):
    """In-kernel register tile: rows processed per inner-loop step, sized so
    the (row_chunk, W*s) select-chain value stays within a handful of vregs."""
    m = _sublane_multiple(dtype)
    wo_pad = _round_up(w * s, _LANE)
    pref = max(m, min(256, (target_elems // wo_pad) // m * m))
    return max(1, math.gcd(t_rows, pref))


def _nearest_upsample_kernel(x_ref, o_ref, *, scale: int, row_chunk: int):
    """x_ref: (T, W) input rows; o_ref: (T, s*W*s) lane-dense output rows.

    o_ref[r, i*W*s + j] = x_ref[r, j // s]   for i in [0, s), j in [0, W*s).
    """
    s = scale
    t, w = x_ref.shape
    wo = w * s
    n_chunks = t // row_chunk

    # Lane index of one width-upsampled row (TPU iota must be >= 2-D).
    lane = jax.lax.broadcasted_iota(jnp.int32, (1, wo), 1)

    def emit(r0):
        xc = x_ref[pl.ds(r0, row_chunk), :]                       # (rc, W)

        # ---- width repeat: xr[:, j] = xc[:, j // s] ----------------------
        # Exact-copy select chain: columns are applied in increasing order,
        # so for lane j the last select whose bound `j >= w_i*s` holds wins,
        # i.e. column floor(j/s).  Pure broadcasts + selects: no arithmetic,
        # -0.0 / NaN are copied bit-exactly.
        xr = jnp.broadcast_to(xc[:, 0:1], (row_chunk, wo))
        for w_i in range(1, w):
            col = jnp.broadcast_to(xc[:, w_i:w_i + 1], (row_chunk, wo))
            xr = jnp.where(lane >= w_i * s, col, xr)

        # ---- height repeat: s contiguous lane-slice stores ---------------
        for i in range(s):
            o_ref[pl.ds(r0, row_chunk), i * wo:(i + 1) * wo] = xr

    if n_chunks == 1:
        emit(0)
    else:
        @pl.loop(0, n_chunks)
        def _(c):
            emit(pl.multiple_of(c * row_chunk, row_chunk))


def upsample_nearest_2d(x, scale_factor=2, *, row_block=None):
    """ApproximatelyInvertibleUpsample.forward for 4-D NCHW input."""
    assert x.ndim == 4, "expects NCHW input"
    # TODO(synk): 3-D (B, C, L) inputs (the avg_pool1d branch of invert) are
    # not implemented.
    s = int(scale_factor)
    assert s >= 1
    if s == 1:
        return x

    B, C, H, W = x.shape
    R = B * C * H
    Wo = W * s
    row_out = s * Wo                      # s height replicas of one upsampled row

    # Free row-major views: input (B*C*H, W); output (B*C*H, s*W*s) which is
    # exactly NCHW (B, C, H*s, W*s) flattened row-major.
    x2 = x.reshape(R, W)

    vmem_cap = _vmem_capacity_bytes()
    vmem_budget = min(24 << 20, vmem_cap // 3)   # ~21 MiB on v7x, 24 MiB elsewhere
    if row_block is None:
        T = _pick_row_block(R, W, s, x.dtype, vmem_budget=vmem_budget)
    else:
        T = int(row_block)
        assert T >= 1 and R % T == 0, f"row_block={T} must divide {R}"
    rc = _pick_row_chunk(T, W, s, x.dtype)

    kernel = functools.partial(_nearest_upsample_kernel, scale=s, row_chunk=rc)

    bytes_in = R * W * x.dtype.itemsize
    out2 = pl.pallas_call(
        kernel,
        out_shape=jax.ShapeDtypeStruct((R, row_out), x.dtype),
        grid_spec=pl.GridSpec(
            grid=(R // T,),
            in_specs=[pl.BlockSpec((T, W), lambda i: (i, 0))],
            out_specs=pl.BlockSpec((T, row_out), lambda i: (i, 0)),
        ),
        compiler_params=pltpu.CompilerParams(
            dimension_semantics=("parallel",),
            vmem_limit_bytes=int(min(48 << 20, (vmem_cap * 3) // 4)),
        ),
        cost_estimate=pl.CostEstimate(
            flops=0,                       # pure data movement
            transcendentals=0,
            bytes_accessed=int(bytes_in * (1 + s * s)),
        ),
    )(x2)

    return out2.reshape(B, C, H * s, W * s)


def upsample_nearest_2d_invert(y, scale_factor=2):
    """ApproximatelyInvertibleUpsample.invert == avg_pool2d(scale_factor).

    Pure reduction glue (not the forward hot path), kept in plain JAX.
    """
    s = int(scale_factor)
    B, C, Ho, Wo = y.shape
    assert Ho % s == 0 and Wo % s == 0
    return y.reshape(B, C, Ho // s, s, Wo // s, s).mean(axis=(3, 5))
    # TODO(synk): the training-time inversion_error_loss / InferenceContext
    # side-channel is host-side Python bookkeeping with no Pallas equivalent.


if __name__ == "__main__":
    # ApproximatelyInvertibleUpsample(scale_factor=2, inversion_error_loss=False)
    scale = 2
    key = jax.random.PRNGKey(0)
    x = jax.random.normal(key, (2, 4, 16, 16), dtype=jnp.float32)

    out = upsample_nearest_2d(x, scale_factor=scale)
    out = jax.block_until_ready(out)

    # Reference: exact nearest-neighbour upsample (same as F.interpolate 'nearest').
    ref = jnp.repeat(jnp.repeat(x, scale, axis=2), scale, axis=3)
    assert out.shape == ref.shape and out.dtype == ref.dtype
    assert bool(jnp.array_equal(out, ref)), "kernel output != nearest-upsample reference"

    # Round trip through the approximate inverse (avg-pool of a nearest
    # upsample recovers the input up to float summation order).
    rec = upsample_nearest_2d_invert(out, scale_factor=scale)
    assert bool(jnp.allclose(rec, x, atol=1e-6, rtol=1e-6))

    print("KERNEL_OK")
</pallas_src>

<mosaic_0001>
module attributes {stable_mosaic.version = 11 : i64} {
  func.func @_nearest_upsample_kernel(%arg0: i32, %arg1: memref<32x16xf32, #tpu.memory_space<vmem>>, %arg2: memref<32x64xf32, #tpu.memory_space<vmem>>) attributes {dimension_semantics = [#tpu.dimension_semantics<parallel>], iteration_bounds = array<i64: 4>, scalar_prefetch = 0 : i64, scratch_operands = 0 : i64, tpu.core_type = #tpu.core_type<tc>, window_params = [{transform_indices = @transform_0, window_bounds = array<i64: 32, 16>}, {transform_indices = @transform_1, window_bounds = array<i64: 32, 64>}]} {
    %0 = tpu.iota {dimensions = array<i32: 1>} : vector<1x32xi32>
    %c0 = arith.constant 0 : index
    %c0_0 = arith.constant 0 : index
    %1 = vector.load %arg1[%c0, %c0_0] : memref<32x16xf32, #tpu.memory_space<vmem>>, vector<32x16xf32>
    %2 = vector.extract_strided_slice %1 {offsets = [0, 0], sizes = [32, 1], strides = [1, 1]} : vector<32x16xf32> to vector<32x1xf32>
    %3 = vector.shape_cast %2 : vector<32x1xf32> to vector<32x1xf32>
    %4 = vector.broadcast %3 : vector<32x1xf32> to vector<32x32xf32>
    %5 = vector.extract_strided_slice %1 {offsets = [0, 1], sizes = [32, 1], strides = [1, 1]} : vector<32x16xf32> to vector<32x1xf32>
    %6 = vector.shape_cast %5 : vector<32x1xf32> to vector<32x1xf32>
    %7 = vector.broadcast %6 : vector<32x1xf32> to vector<32x32xf32>
    %c2_i32 = arith.constant 2 : i32
    %8 = vector.broadcast %c2_i32 : i32 to vector<1x32xi32>
    %9 = arith.cmpi sge, %0, %8 : vector<1x32xi32>
    %10 = vector.shape_cast %9 : vector<1x32xi1> to vector<1x32xi1>
    %11 = vector.broadcast %10 : vector<1x32xi1> to vector<32x32xi1>
    %12 = arith.select %11, %7, %4 : vector<32x32xi1>, vector<32x32xf32>
    %13 = vector.extract_strided_slice %1 {offsets = [0, 2], sizes = [32, 1], strides = [1, 1]} : vector<32x16xf32> to vector<32x1xf32>
    %14 = vector.shape_cast %13 : vector<32x1xf32> to vector<32x1xf32>
    %15 = vector.broadcast %14 : vector<32x1xf32> to vector<32x32xf32>
    %c4_i32 = arith.constant 4 : i32
    %16 = vector.broadcast %c4_i32 : i32 to vector<1x32xi32>
    %17 = arith.cmpi sge, %0, %16 : vector<1x32xi32>
    %18 = vector.shape_cast %17 : vector<1x32xi1> to vector<1x32xi1>
    %19 = vector.broadcast %18 : vector<1x32xi1> to vector<32x32xi1>
    %20 = arith.select %19, %15, %12 : vector<32x32xi1>, vector<32x32xf32>
    %21 = vector.extract_strided_slice %1 {offsets = [0, 3], sizes = [32, 1], strides = [1, 1]} : vector<32x16xf32> to vector<32x1xf32>
    %22 = vector.shape_cast %21 : vector<32x1xf32> to vector<32x1xf32>
    %23 = vector.broadcast %22 : vector<32x1xf32> to vector<32x32xf32>
    %c6_i32 = arith.constant 6 : i32
    %24 = vector.broadcast %c6_i32 : i32 to vector<1x32xi32>
    %25 = arith.cmpi sge, %0, %24 : vector<1x32xi32>
    %26 = vector.shape_cast %25 : vector<1x32xi1> to vector<1x32xi1>
    %27 = vector.broadcast %26 : vector<1x32xi1> to vector<32x32xi1>
    %28 = arith.select %27, %23, %20 : vector<32x32xi1>, vector<32x32xf32>
    %29 = vector.extract_strided_slice %1 {offsets = [0, 4], sizes = [32, 1], strides = [1, 1]} : vector<32x16xf32> to vector<32x1xf32>
    %30 = vector.shape_cast %29 : vector<32x1xf32> to vector<32x1xf32>
    %31 = vector.broadcast %30 : vector<32x1xf32> to vector<32x32xf32>
    %c8_i32 = arith.constant 8 : i32
    %32 = vector.broadcast %c8_i32 : i32 to vector<1x32xi32>
    %33 = arith.cmpi sge, %0, %32 : vector<1x32xi32>
    %34 = vector.shape_cast %33 : vector<1x32xi1> to vector<1x32xi1>
    %35 = vector.broadcast %34 : vector<1x32xi1> to vector<32x32xi1>
    %36 = arith.select %35, %31, %28 : vector<32x32xi1>, vector<32x32xf32>
    %37 = vector.extract_strided_slice %1 {offsets = [0, 5], sizes = [32, 1], strides = [1, 1]} : vector<32x16xf32> to vector<32x1xf32>
    %38 = vector.shape_cast %37 : vector<32x1xf32> to vector<32x1xf32>
    %39 = vector.broadcast %38 : vector<32x1xf32> to vector<32x32xf32>
    %c10_i32 = arith.constant 10 : i32
    %40 = vector.broadcast %c10_i32 : i32 to vector<1x32xi32>
    %41 = arith.cmpi sge, %0, %40 : vector<1x32xi32>
    %42 = vector.shape_cast %41 : vector<1x32xi1> to vector<1x32xi1>
    %43 = vector.broadcast %42 : vector<1x32xi1> to vector<32x32xi1>
    %44 = arith.select %43, %39, %36 : vector<32x32xi1>, vector<32x32xf32>
    %45 = vector.extract_strided_slice %1 {offsets = [0, 6], sizes = [32, 1], strides = [1, 1]} : vector<32x16xf32> to vector<32x1xf32>
    %46 = vector.shape_cast %45 : vector<32x1xf32> to vector<32x1xf32>
    %47 = vector.broadcast %46 : vector<32x1xf32> to vector<32x32xf32>
    %c12_i32 = arith.constant 12 : i32
    %48 = vector.broadcast %c12_i32 : i32 to vector<1x32xi32>
    %49 = arith.cmpi sge, %0, %48 : vector<1x32xi32>
    %50 = vector.shape_cast %49 : vector<1x32xi1> to vector<1x32xi1>
    %51 = vector.broadcast %50 : vector<1x32xi1> to vector<32x32xi1>
    %52 = arith.select %51, %47, %44 : vector<32x32xi1>, vector<32x32xf32>
    %53 = vector.extract_strided_slice %1 {offsets = [0, 7], sizes = [32, 1], strides = [1, 1]} : vector<32x16xf32> to vector<32x1xf32>
    %54 = vector.shape_cast %53 : vector<32x1xf32> to vector<32x1xf32>
    %55 = vector.broadcast %54 : vector<32x1xf32> to vector<32x32xf32>
    %c14_i32 = arith.constant 14 : i32
    %56 = vector.broadcast %c14_i32 : i32 to vector<1x32xi32>
    %57 = arith.cmpi sge, %0, %56 : vector<1x32xi32>
    %58 = vector.shape_cast %57 : vector<1x32xi1> to vector<1x32xi1>
    %59 = vector.broadcast %58 : vector<1x32xi1> to vector<32x32xi1>
    %60 = arith.select %59, %55, %52 : vector<32x32xi1>, vector<32x32xf32>
    %61 = vector.extract_strided_slice %1 {offsets = [0, 8], sizes = [32, 1], strides = [1, 1]} : vector<32x16xf32> to vector<32x1xf32>
    %62 = vector.shape_cast %61 : vector<32x1xf32> to vector<32x1xf32>
    %63 = vector.broadcast %62 : vector<32x1xf32> to vector<32x32xf32>
    %c16_i32 = arith.constant 16 : i32
    %64 = vector.broadcast %c16_i32 : i32 to vector<1x32xi32>
    %65 = arith.cmpi sge, %0, %64 : vector<1x32xi32>
    %66 = vector.shape_cast %65 : vector<1x32xi1> to vector<1x32xi1>
    %67 = vector.broadcast %66 : vector<1x32xi1> to vector<32x32xi1>
    %68 = arith.select %67, %63, %60 : vector<32x32xi1>, vector<32x32xf32>
    %69 = vector.extract_strided_slice %1 {offsets = [0, 9], sizes = [32, 1], strides = [1, 1]} : vector<32x16xf32> to vector<32x1xf32>
    %70 = vector.shape_cast %69 : vector<32x1xf32> to vector<32x1xf32>
    %71 = vector.broadcast %70 : vector<32x1xf32> to vector<32x32xf32>
    %c18_i32 = arith.constant 18 : i32
    %72 = vector.broadcast %c18_i32 : i32 to vector<1x32xi32>
    %73 = arith.cmpi sge, %0, %72 : vector<1x32xi32>
    %74 = vector.shape_cast %73 : vector<1x32xi1> to vector<1x32xi1>
    %75 = vector.broadcast %74 : vector<1x32xi1> to vector<32x32xi1>
    %76 = arith.select %75, %71, %68 : vector<32x32xi1>, vector<32x32xf32>
    %77 = vector.extract_strided_slice %1 {offsets = [0, 10], sizes = [32, 1], strides = [1, 1]} : vector<32x16xf32> to vector<32x1xf32>
    %78 = vector.shape_cast %77 : vector<32x1xf32> to vector<32x1xf32>
    %79 = vector.broadcast %78 : vector<32x1xf32> to vector<32x32xf32>
    %c20_i32 = arith.constant 20 : i32
    %80 = vector.broadcast %c20_i32 : i32 to vector<1x32xi32>
    %81 = arith.cmpi sge, %0, %80 : vector<1x32xi32>
    %82 = vector.shape_cast %81 : vector<1x32xi1> to vector<1x32xi1>
    %83 = vector.broadcast %82 : vector<1x32xi1> to vector<32x32xi1>
    %84 = arith.select %83, %79, %76 : vector<32x32xi1>, vector<32x32xf32>
    %85 = vector.extract_strided_slice %1 {offsets = [0, 11], sizes = [32, 1], strides = [1, 1]} : vector<32x16xf32> to vector<32x1xf32>
    %86 = vector.shape_cast %85 : vector<32x1xf32> to vector<32x1xf32>
    %87 = vector.broadcast %86 : vector<32x1xf32> to vector<32x32xf32>
    %c22_i32 = arith.constant 22 : i32
    %88 = vector.broadcast %c22_i32 : i32 to vector<1x32xi32>
    %89 = arith.cmpi sge, %0, %88 : vector<1x32xi32>
    %90 = vector.shape_cast %89 : vector<1x32xi1> to vector<1x32xi1>
    %91 = vector.broadcast %90 : vector<1x32xi1> to vector<32x32xi1>
    %92 = arith.select %91, %87, %84 : vector<32x32xi1>, vector<32x32xf32>
    %93 = vector.extract_strided_slice %1 {offsets = [0, 12], sizes = [32, 1], strides = [1, 1]} : vector<32x16xf32> to vector<32x1xf32>
    %94 = vector.shape_cast %93 : vector<32x1xf32> to vector<32x1xf32>
    %95 = vector.broadcast %94 : vector<32x1xf32> to vector<32x32xf32>
    %c24_i32 = arith.constant 24 : i32
    %96 = vector.broadcast %c24_i32 : i32 to vector<1x32xi32>
    %97 = arith.cmpi sge, %0, %96 : vector<1x32xi32>
    %98 = vector.shape_cast %97 : vector<1x32xi1> to vector<1x32xi1>
    %99 = vector.broadcast %98 : vector<1x32xi1> to vector<32x32xi1>
    %100 = arith.select %99, %95, %92 : vector<32x32xi1>, vector<32x32xf32>
    %101 = vector.extract_strided_slice %1 {offsets = [0, 13], sizes = [32, 1], strides = [1, 1]} : vector<32x16xf32> to vector<32x1xf32>
    %102 = vector.shape_cast %101 : vector<32x1xf32> to vector<32x1xf32>
    %103 = vector.broadcast %102 : vector<32x1xf32> to vector<32x32xf32>
    %c26_i32 = arith.constant 26 : i32
    %104 = vector.broadcast %c26_i32 : i32 to vector<1x32xi32>
    %105 = arith.cmpi sge, %0, %104 : vector<1x32xi32>
    %106 = vector.shape_cast %105 : vector<1x32xi1> to vector<1x32xi1>
    %107 = vector.broadcast %106 : vector<1x32xi1> to vector<32x32xi1>
    %108 = arith.select %107, %103, %100 : vector<32x32xi1>, vector<32x32xf32>
    %109 = vector.extract_strided_slice %1 {offsets = [0, 14], sizes = [32, 1], strides = [1, 1]} : vector<32x16xf32> to vector<32x1xf32>
    %110 = vector.shape_cast %109 : vector<32x1xf32> to vector<32x1xf32>
    %111 = vector.broadcast %110 : vector<32x1xf32> to vector<32x32xf32>
    %c28_i32 = arith.constant 28 : i32
    %112 = vector.broadcast %c28_i32 : i32 to vector<1x32xi32>
    %113 = arith.cmpi sge, %0, %112 : vector<1x32xi32>
    %114 = vector.shape_cast %113 : vector<1x32xi1> to vector<1x32xi1>
    %115 = vector.broadcast %114 : vector<1x32xi1> to vector<32x32xi1>
    %116 = arith.select %115, %111, %108 : vector<32x32xi1>, vector<32x32xf32>
    %117 = vector.extract_strided_slice %1 {offsets = [0, 15], sizes = [32, 1], strides = [1, 1]} : vector<32x16xf32> to vector<32x1xf32>
    %118 = vector.shape_cast %117 : vector<32x1xf32> to vector<32x1xf32>
    %119 = vector.broadcast %118 : vector<32x1xf32> to vector<32x32xf32>
    %c30_i32 = arith.constant 30 : i32
    %120 = vector.broadcast %c30_i32 : i32 to vector<1x32xi32>
    %121 = arith.cmpi sge, %0, %120 : vector<1x32xi32>
    %122 = vector.shape_cast %121 : vector<1x32xi1> to vector<1x32xi1>
    %123 = vector.broadcast %122 : vector<1x32xi1> to vector<32x32xi1>
    %124 = arith.select %123, %119, %116 : vector<32x32xi1>, vector<32x32xf32>
    %c0_1 = arith.constant 0 : index
    %c0_2 = arith.constant 0 : index
    %125 = vector.load %arg2[%c0_1, %c0_2] : memref<32x64xf32, #tpu.memory_space<vmem>>, vector<32x32xf32>
    tpu.vector_store %arg2[%c0_1, %c0_2], %124 {strides = array<i32>} : memref<32x64xf32, #tpu.memory_space<vmem>>, vector<32x32xf32>,
    %c0_3 = arith.constant 0 : index
    %c32 = arith.constant 32 : index
    %126 = vector.load %arg2[%c0_3, %c32] : memref<32x64xf32, #tpu.memory_space<vmem>>, vector<32x32xf32>
    tpu.vector_store %arg2[%c0_3, %c32], %124 {strides = array<i32>} : memref<32x64xf32, #tpu.memory_space<vmem>>, vector<32x32xf32>,
    return
  }
  func.func @transform_0(%arg0: i32) -> (i32, i32) {
    %c0_i32 = arith.constant 0 : i32
    %c0_i32_0 = arith.constant 0 : i32
    return %arg0, %c0_i32 : i32, i32
  }
  func.func @transform_1(%arg0: i32) -> (i32, i32) {
    %c0_i32 = arith.constant 0 : i32
    %c0_i32_0 = arith.constant 0 : i32
    return %arg0, %c0_i32 : i32, i32
  }
}

</mosaic_0001>

<bundles_post_ra>
// kernel: tpu_custom_call.1
= control target key start
LH: loop header
LB: loop body
LE: loop exit
PB: predicated region body
PF: predicated region fallthrough
CT: control target
= control target key end

     0   :  { %s676_s6 = smov 0   ;;  %s893_s0 = inlined_call_operand.vmem [shape: f32[128,16], index: 0, kind: input, shape index: {}]   ;;  %s894_s1 = inlined_call_operand.vmem [shape: f32[128,64], index: 1, kind: output, shape index: {}]  }
   0x1 LB: > { %s573_s7 = sadd.s32 4294967295, %s647_s6   ;;  %p577_p0 = scmp.ge.s32.totalorder %s647_s6, 1  ;;  %s647_s6 = sphi %s676_s6, %s11_s6  }
   0x2   : > { %p88_p1 = scmp.lt.s32.totalorder %s647_s6, 5 }
   0x4   : > { %p89_p2 = pnand %p577_p0, %p88_p1 }
   0x5   : > { %s578_s8 = sshll.u32 (!%p89_p2), %s573_s7, 2  ;;  %s665_s16 = smov (!%p89_p2), 32  }
   0x6   : > { %92 = sbr.rel (%p89_p2) target bundleno = 423 (0x1a7), region = 24  ;;  %p109_p3 = scmp.lt.s32.totalorder (!%p89_p2), %s578_s8, 15 }
   0xb   : > { %v649_v0 = vmov 0   ;;  %s896_s8 = smov (!%p109_p3, %s578_s8), 15  ;;  %v650_v5 = vmov 1   ;;  %v651_v6 = vmov 2   ;;  %v652_v7 = vmov 3  }
   0xc   : > { %610 = vset.pattern.permute.xlu1 %v649_v0  ;;  %609 = vset.pattern.permute.xlu0 %v649_v0  ;;  %s579_s9 = sshll.u32 %s896_s8, 3  ;;  %v653_v8 = vmov 4   ;;  %v654_v9 = vmov 5   ;;  %v655_v10 = vmov 6   ;;  %v656_v11 = vmov 7  }
   0xd   : > { %s112_s12 = scalar_lea.vmem %s893_s0, %s579_s9  ;;  %v657_v12 = vmov 8   ;;  %v658_v13 = vmov 9   ;;  %v659_v14 = vmov 10   ;;  %v660_v15 = vmov 11   ;;  %s824_s15 = scalar_lea.vmem %s894_s1, %s579_s9 }
   0xe   : > { %v692_v1 = vld [vmem:[%s112_s12 + $0x10] sm:$0xff]  ;;  %v694_v2 = vld [vmem:[%s112_s12] sm:$0xff]  ;;  %v698_v3 = vld [vmem:[%s112_s12 + $0x18] sm:$0xff]  ;;  %v661_v16 = vmov 12   ;;  %v662_v17 = vmov 13   ;;  %v663_v18 = vmov 14   ;;  %v120_v20 = vlaneseq }
   0xf   : > { %138 = vperm.xlu1 %610, %v692_v1   ;;  %128 = vperm.xlu0 %609, %v694_v2   ;;  %v700_v4 = vld [vmem:[%s112_s12 + $0x8] sm:$0xff]  ;;  %v664_v19 = vmov 15   ;;  %vm491_vm15 = vcmask 261120  }
  0x10   : > { %v754_v23 = vand.u32 127, %v120_v20 }
  0x12   : > { %vm162_vm0 = vcmp.ge.s32.totalorder %v754_v23, 2  ;;  %vm185_vm1 = vcmp.ge.s32.totalorder %v754_v23, 4  ;;  %vm208_vm2 = vcmp.ge.s32.totalorder %v754_v23, 6  ;;  %vm231_vm3 = vcmp.ge.s32.totalorder %v754_v23, 8 }
  0x13   : > { %143 = vperm.xlu1 %610, %v698_v3   ;;  %133 = vperm.xlu0 %609, %v700_v4   ;;  %vm254_vm4 = vcmp.ge.s32.totalorder %v754_v23, 10  ;;  %vm277_vm5 = vcmp.ge.s32.totalorder %v754_v23, 12  ;;  %vm300_vm6 = vcmp.ge.s32.totalorder %v754_v23, 14  ;;  %vm323_vm7 = vcmp.ge.s32.totalorder %v754_v23, 16 }
  0x14   : > { %vm346_vm8 = vcmp.ge.s32.totalorder %v754_v23, 18  ;;  %vm369_vm9 = vcmp.ge.s32.totalorder %v754_v23, 20  ;;  %vm392_vm10 = vcmp.ge.s32.totalorder %v754_v23, 22  ;;  %vm415_vm11 = vcmp.ge.s32.totalorder %v754_v23, 24 }
  0x15   : > { %vm438_vm12 = vcmp.ge.s32.totalorder %v754_v23, 26  ;;  %vm484_vm13 = vcmp.ge.s32.totalorder %v754_v23, 30  ;;  %vm461_vm14 = vcmp.ge.s32.totalorder %v754_v23, 28 }
  0x17   : > { %612 = vset.pattern.permute.xlu1 %v650_v5  ;;  %611 = vset.pattern.permute.xlu0 %v650_v5 }
  0x18   : > { %151 = vperm.xlu1 %612, %v700_v4   ;;  %147 = vperm.xlu0 %611, %v694_v2  }
  0x1c   : > { %155 = vperm.xlu1 %612, %v692_v1   ;;  %159 = vperm.xlu0 %611, %v698_v3  }
  0x20   : > { %613 = vset.pattern.permute.xlu1 %v651_v6  ;;  %614 = vset.pattern.permute.xlu0 %v651_v6 }
  0x21   : > { %170 = vperm.xlu1 %613, %v694_v2   ;;  %174 = vperm.xlu0 %614, %v700_v4  }
  0x25   : > { %178 = vperm.xlu1 %613, %v692_v1   ;;  %615 = vset.pattern.permute.xlu0 %v652_v7 }
  0x26   : > { %193 = vperm.xlu0 %615, %v694_v2  }
  0x29   : > { %182 = vperm.xlu1 %613, %v698_v3  }
  0x2a   : > { %205 = vperm.xlu0 %615, %v698_v3  }
  0x2d   : > { %616 = vset.pattern.permute.xlu1 %v652_v7 }
  0x2e   : > { %197 = vperm.xlu1 %616, %v700_v4   ;;  %618 = vset.pattern.permute.xlu0 %v653_v8 }
  0x2f   : > { %220 = vperm.xlu0 %618, %v700_v4  }
  0x32   : > { %201 = vperm.xlu1 %616, %v692_v1  }
  0x33   : > { %619 = vset.pattern.permute.xlu0 %v654_v9 }
  0x34   : > { %239 = vperm.xlu0 %619, %v694_v2  }
  0x36   : > { %617 = vset.pattern.permute.xlu1 %v653_v8 }
  0x37   : > { %216 = vperm.xlu1 %617, %v694_v2  }
  0x38   : > { %251 = vperm.xlu0 %619, %v698_v3  }
  0x3b   : > { %224 = vperm.xlu1 %617, %v692_v1  }
  0x3c   : > { %622 = vset.pattern.permute.xlu0 %v655_v10 }
  0x3d   : > { %266 = vperm.xlu0 %622, %v700_v4  }
  0x3f   : > { %228 = vperm.xlu1 %617, %v698_v3  }
  0x41   : > { %623 = vset.pattern.permute.xlu0 %v656_v11 }
  0x42   : > { %285 = vperm.xlu0 %623, %v694_v2  }
  0x43   : > { %620 = vset.pattern.permute.xlu1 %v654_v9 }
  0x44   : > { %243 = vperm.xlu1 %620, %v700_v4  }
  0x46   : > { %297 = vperm.xlu0 %623, %v698_v3  }
  0x48   : > { %247 = vperm.xlu1 %620, %v692_v1  }
  0x4a   : > { %626 = vset.pattern.permute.xlu0 %v657_v12 }
  0x4b   : > { %312 = vperm.xlu0 %626, %v700_v4  }
  0x4c   : > { %621 = vset.pattern.permute.xlu1 %v655_v10 }
  0x4d   : > { %262 = vperm.xlu1 %621, %v694_v2  }
  0x4f   : > { %627 = vset.pattern.permute.xlu0 %v658_v13 }
  0x50   : > { %331 = vperm.xlu0 %627, %v694_v2  }
  0x51   : > { %270 = vperm.xlu1 %621, %v692_v1  }
  0x54   : > { %343 = vperm.xlu0 %627, %v698_v3  }
  0x55   : > { %274 = vperm.xlu1 %621, %v698_v3  }
  0x58   : > { %630 = vset.pattern.permute.xlu0 %v659_v14 }
  0x59   : > { %624 = vset.pattern.permute.xlu1 %v656_v11  ;;  %358 = vperm.xlu0 %630, %v700_v4  }
  0x5a   : > { %289 = vperm.xlu1 %624, %v700_v4  }
  0x5d   : > { %631 = vset.pattern.permute.xlu0 %v660_v15 }
  0x5e   : > { %293 = vperm.xlu1 %624, %v692_v1   ;;  %377 = vperm.xlu0 %631, %v694_v2  }
  0x62   : > { %625 = vset.pattern.permute.xlu1 %v657_v12  ;;  %389 = vperm.xlu0 %631, %v698_v3  }
  0x63   : > { %308 = vperm.xlu1 %625, %v694_v2  }
  0x66   : > { %634 = vset.pattern.permute.xlu0 %v661_v16 }
  0x67   : > { %316 = vperm.xlu1 %625, %v692_v1   ;;  %404 = vperm.xlu0 %634, %v700_v4  }
  0x6b   : > { %320 = vperm.xlu1 %625, %v698_v3   ;;  %635 = vset.pattern.permute.xlu0 %v662_v17 }
  0x6c   : > { %423 = vperm.xlu0 %635, %v694_v2  }
  0x6f   : > { %628 = vset.pattern.permute.xlu1 %v658_v13 }
  0x70   : > { %335 = vperm.xlu1 %628, %v700_v4   ;;  %435 = vperm.xlu0 %635, %v698_v3  }
  0x74   : > { %339 = vperm.xlu1 %628, %v692_v1   ;;  %638 = vset.pattern.permute.xlu0 %v663_v18 }
  0x75   : > { %450 = vperm.xlu0 %638, %v700_v4  }
  0x78   : > { %629 = vset.pattern.permute.xlu1 %v659_v14 }
  0x79   : > { %354 = vperm.xlu1 %629, %v694_v2   ;;  %639 = vset.pattern.permute.xlu0 %v664_v19 }
  0x7a   : > { %469 = vperm.xlu0 %639, %v694_v2  }
  0x7d   : > { %362 = vperm.xlu1 %629, %v692_v1  }
  0x7e   : > { %481 = vperm.xlu0 %639, %v698_v3  }
  0x81   : > { %366 = vperm.xlu1 %629, %v698_v3  }
  0x85   : > { %632 = vset.pattern.permute.xlu1 %v660_v15 }
  0x86   : > { %381 = vperm.xlu1 %632, %v700_v4  }
  0x8a   : > { %v139_v21 = vpop.permute.xlu1 %138  ;;  %385 = vperm.xlu1 %632, %v692_v1   ;;  %v129_v22 = vpop.permute.xlu0 %128 }
  0x8e   : > { %v144_v24 = vpop.permute.xlu1 %143  ;;  %633 = vset.pattern.permute.xlu1 %v661_v16  ;;  %v134_v25 = vpop.permute.xlu0 %133 }
  0x8f   : > { %400 = vperm.xlu1 %633, %v694_v2  }
  0x93   : > { %v152_v26 = vpop.permute.xlu1 %151  ;;  %408 = vperm.xlu1 %633, %v692_v1   ;;  %v148_v27 = vpop.permute.xlu0 %147 }
  0x94   : > { %v166_v28 = vsel %vm162_vm0, %v152_v26, %v134_v25  ;;  %v165_v29 = vsel %vm162_vm0, %v148_v27, %v129_v22 }
  0x97   : > { %v156_v30 = vpop.permute.xlu1 %155  ;;  %412 = vperm.xlu1 %633, %v698_v3   ;;  %v160_v31 = vpop.permute.xlu0 %159 }
  0x98   : > { %v167_v32 = vsel %vm162_vm0, %v156_v30, %v139_v21  ;;  %v168_v33 = vsel %vm162_vm0, %v160_v31, %v144_v24  ;;  %vm512_vm0 = vcmask 523520  }
  0x9b   : > { %636 = vset.pattern.permute.xlu1 %v662_v17 }
  0x9c   : > { %427 = vperm.xlu1 %636, %v700_v4   ;;  %v171_v34 = vpop.permute.xlu1 %170  ;;  %v175_v35 = vpop.permute.xlu0 %174 }
  0x9d   : > { %v188_v36 = vsel %vm185_vm1, %v171_v34, %v165_v29  ;;  %v189_v37 = vsel %vm185_vm1, %v175_v35, %v166_v28 }
  0xa0   : > { %431 = vperm.xlu1 %636, %v692_v1   ;;  %v179_v38 = vpop.permute.xlu1 %178 }
  0xa1   : > { %v190_v39 = vsel %vm185_vm1, %v179_v38, %v167_v32  ;;  %v194_v40 = vpop.permute.xlu0 %193 }
  0xa2   : > { %v211_v51 = vsel %vm208_vm2, %v194_v40, %v188_v36 }
  0xa4   : > { %637 = vset.pattern.permute.xlu1 %v663_v18  ;;  %v183_v41 = vpop.permute.xlu1 %182 }
  0xa5   : > { %v191_v42 = vsel %vm185_vm1, %v183_v41, %v168_v33  ;;  %446 = vperm.xlu1 %637, %v694_v2   ;;  %v206_v43 = vpop.permute.xlu0 %205 }
  0xa6   : > { %v214_v44 = vsel %vm208_vm2, %v206_v43, %v191_v42 }
  0xa9   : > { %454 = vperm.xlu1 %637, %v692_v1   ;;  %v198_v45 = vpop.permute.xlu1 %197 }
  0xaa   : > { %v212_v46 = vsel %vm208_vm2, %v198_v45, %v189_v37  ;;  %v221_v47 = vpop.permute.xlu0 %220 }
  0xab   : > { %v235_v48 = vsel %vm231_vm3, %v221_v47, %v212_v46 }
  0xad   : > { %458 = vperm.xlu1 %637, %v698_v3   ;;  %v202_v49 = vpop.permute.xlu1 %201 }
  0xae   : > { %v213_v50 = vsel %vm208_vm2, %v202_v49, %v190_v39 }
  0xaf   : > { %v240_v62 = vpop.permute.xlu0 %239 }
  0xb1   : > { %640 = vset.pattern.permute.xlu1 %v664_v19 }
  0xb2   : > { %473 = vperm.xlu1 %640, %v700_v4   ;;  %v217_v52 = vpop.permute.xlu1 %216 }
  0xb3   : > { %v234_v53 = vsel %vm231_vm3, %v217_v52, %v211_v51  ;;  %v252_v2 = vpop.permute.xlu0 %251 }
  0xb4   : > { %v257_v63 = vsel %vm254_vm4, %v240_v62, %v234_v53 }
  0xb6   : > { %477 = vperm.xlu1 %640, %v692_v1   ;;  %v225_v54 = vpop.permute.xlu1 %224 }
  0xb7   : > { %v236_v55 = vsel %vm231_vm3, %v225_v54, %v213_v50 }
  0xb8   : > { %v267_v8 = vpop.permute.xlu0 %266 }
  0xba   : > { %v229_v56 = vpop.permute.xlu1 %228 }
  0xbb   : > { %v237_v57 = vsel %vm231_vm3, %v229_v56, %v214_v44 }
  0xbc   : > { %v260_v5 = vsel %vm254_vm4, %v252_v2, %v237_v57 }
  0xbd   : > { %v286_v18 = vpop.permute.xlu0 %285 }
  0xbf   : > { %v244_v58 = vpop.permute.xlu1 %243 }
  0xc0   : > { %v258_v59 = vsel %vm254_vm4, %v244_v58, %v235_v48 }
  0xc1   : > { %v281_v9 = vsel %vm277_vm5, %v267_v8, %v258_v59  ;;  %v298_v19 = vpop.permute.xlu0 %297 }
  0xc3   : > { %v248_v60 = vpop.permute.xlu1 %247 }
  0xc4   : > { %v259_v61 = vsel %vm254_vm4, %v248_v60, %v236_v55 }
  0xc6   : > { %v313_v22 = vpop.permute.xlu0 %312 }
  0xc8   : > { %v263_v0 = vpop.permute.xlu1 %262 }
  0xc9   : > { %v280_v1 = vsel %vm277_vm5, %v263_v0, %v257_v63 }
  0xca   : > { %v303_v39 = vsel %vm300_vm6, %v286_v18, %v280_v1 }
  0xcb   : > { %v332_v25 = vpop.permute.xlu0 %331 }
  0xcc   : > { %v271_v3 = vpop.permute.xlu1 %270 }
  0xcd   : > { %v282_v4 = vsel %vm277_vm5, %v271_v3, %v259_v61 }
  0xcf   : > { %v344_v27 = vpop.permute.xlu0 %343 }
  0xd0   : > { %v275_v6 = vpop.permute.xlu1 %274 }
  0xd1   : > { %v283_v7 = vsel %vm277_vm5, %v275_v6, %v260_v5 }
  0xd2   : > { %v306_v47 = vsel %vm300_vm6, %v298_v19, %v283_v7 }
  0xd4   : > { %v359_v29 = vpop.permute.xlu0 %358 }
  0xd5   : > { %v290_v10 = vpop.permute.xlu1 %289 }
  0xd6   : > { %v304_v11 = vsel %vm300_vm6, %v290_v10, %v281_v9 }
  0xd7   : > { %v327_v55 = vsel %vm323_vm7, %v313_v22, %v304_v11 }
  0xd9   : > { %v294_v12 = vpop.permute.xlu1 %293  ;;  %v378_v31 = vpop.permute.xlu0 %377 }
  0xda   : > { %v305_v13 = vsel %vm300_vm6, %v294_v12, %v282_v4 }
  0xdd   : > { %v390_v33 = vpop.permute.xlu0 %389 }
  0xde   : > { %v309_v14 = vpop.permute.xlu1 %308 }
  0xdf   : > { %v326_v40 = vsel %vm323_vm7, %v309_v14, %v303_v39 }
  0xe0   : > { %v349_v43 = vsel %vm346_vm8, %v332_v25, %v326_v40 }
  0xe2   : > { %v317_v15 = vpop.permute.xlu1 %316  ;;  %v405_v35 = vpop.permute.xlu0 %404 }
  0xe3   : > { %v788_v16 = vsel %vm323_vm7, %v317_v15, %v305_v13 }
  0xe6   : > { %v321_v17 = vpop.permute.xlu1 %320 }
  0xe7   : > { %v424_v37 = vpop.permute.xlu0 %423  ;;  %v329_v49 = vsel %vm323_vm7, %v321_v17, %v306_v47 }
  0xe8   : > { %v352_v52 = vsel %vm346_vm8, %v344_v27, %v329_v49 }
  0xeb   : > { %v336_v20 = vpop.permute.xlu1 %335  ;;  %v436_v41 = vpop.permute.xlu0 %435 }
  0xec   : > { %v350_v58 = vsel %vm346_vm8, %v336_v20, %v327_v55 }
  0xed   : > { %v373_v62 = vsel %vm369_vm9, %v359_v29, %v350_v58 }
  0xef   : > { %v790_v21 = vpop.permute.xlu1 %339 }
  0xf0   : > { %v451_v45 = vpop.permute.xlu0 %450  ;;  %v351_v8 = vsel %vm346_vm8, %v790_v21, %v788_v16 }
  0xf4   : > { %v355_v24 = vpop.permute.xlu1 %354 }
  0xf5   : > { %v372_v44 = vsel %vm369_vm9, %v355_v24, %v349_v43  ;;  %v470_v51 = vpop.permute.xlu0 %469 }
  0xf6   : > { %v395_v48 = vsel %vm392_vm10, %v378_v31, %v372_v44 }
  0xf8   : > { %v363_v26 = vpop.permute.xlu1 %362 }
  0xf9   : > { %v482_v1 = vpop.permute.xlu0 %481  ;;  %v374_v9 = vsel %vm369_vm9, %v363_v26, %v351_v8 }
  0xfc   : > { %v367_v28 = vpop.permute.xlu1 %366 }
  0xfd   : > { %v375_v56 = vsel %vm369_vm9, %v367_v28, %v352_v52 }
  0xfe   : > { %v398_v60 = vsel %vm392_vm10, %v390_v33, %v375_v56 }
 0x101   : > { %v382_v30 = vpop.permute.xlu1 %381 }
 0x102   : > { %v396_v0 = vsel %vm392_vm10, %v382_v30, %v373_v62 }
 0x103   : > { %v419_v4 = vsel %vm415_vm11, %v405_v35, %v396_v0 }
 0x105   : > { %v386_v32 = vpop.permute.xlu1 %385 }
 0x106   : > { %v397_v12 = vsel %vm392_vm10, %v386_v32, %v374_v9 }
 0x10a   : > { %v401_v34 = vpop.permute.xlu1 %400 }
 0x10b   : > { %v418_v50 = vsel %vm415_vm11, %v401_v34, %v395_v48 }
 0x10c   : > { %v441_v53 = vsel %vm438_vm12, %v424_v37, %v418_v50 }
 0x10e   : > { %v409_v36 = vpop.permute.xlu1 %408 }
 0x10f   : > { %v420_v14 = vsel %vm415_vm11, %v409_v36, %v397_v12 }
 0x112   : > { %v413_v38 = vpop.permute.xlu1 %412 }
 0x113   : > { %v421_v63 = vsel %vm415_vm11, %v413_v38, %v398_v60 }
 0x114   : > { %v444_v2 = vsel %vm438_vm12, %v436_v41, %v421_v63 }
 0x117   : > { %v428_v42 = vpop.permute.xlu1 %427 }
 0x118   : > { %v442_v6 = vsel %vm438_vm12, %v428_v42, %v419_v4 }
 0x119   : > { %v465_v10 = vsel %vm461_vm14, %v451_v45, %v442_v6 }
 0x11b   : > { %v432_v46 = vpop.permute.xlu1 %431 }
 0x11c   : > { %v443_v15 = vsel %vm438_vm12, %v432_v46, %v420_v14 }
 0x120   : > { %v447_v54 = vpop.permute.xlu1 %446 }
 0x121   : > { %v464_v57 = vsel %vm461_vm14, %v447_v54, %v441_v53 }
 0x122   : > { %v487_v59 = vsel %vm484_vm13, %v470_v51, %v464_v57 }
 0x123   : > { %500 = vrot.lane.b32.xlu1 %v487_v59, %s665_s16  ;;  %492 = vst.msk [vmem:[%s824_s15] sm:$0xff] %vm491_vm15, %v487_v59 }
 0x124   : > { %v455_v61 = vpop.permute.xlu1 %454 }
 0x125   : > { %v466_v16 = vsel %vm461_vm14, %v455_v61, %v443_v15 }
 0x128   : > { %v459_v3 = vpop.permute.xlu1 %458 }
 0x129   : > { %v467_v5 = vsel %vm461_vm14, %v459_v3, %v444_v2 }
 0x12a   : > { %v490_v7 = vsel %vm484_vm13, %v482_v1, %v467_v5 }
 0x12b   : > { %495 = vst.msk [vmem:[%s824_s15 + $0x18] sm:$0xff] %vm491_vm15, %v490_v7 }
 0x12d   : > { %v474_v11 = vpop.permute.xlu1 %473 }
 0x12e   : > { %v488_v13 = vsel %vm484_vm13, %v474_v11, %v465_v10 }
 0x12f   : > { %502 = vrot.lane.b32.xlu0 %v488_v13, %s665_s16  ;;  %493 = vst.msk [vmem:[%s824_s15 + $0x8] sm:$0xff] %vm491_vm15, %v488_v13 }
 0x131   : > { %v478_v17 = vpop.permute.xlu1 %477 }
 0x132   : > { %v489_v18 = vsel %vm484_vm13, %v478_v17, %v466_v16 }
 0x133   : > { %494 = vst.msk [vmem:[%s824_s15 + $0x10] sm:$0xff] %vm491_vm15, %v489_v18  ;;  %504 = vrot.lane.b32.xlu1 %v489_v18, %s665_s16  ;;  %506 = vrot.lane.b32.xlu0 %v490_v7, %s665_s16 }
 0x195   : > { %v501_v19 = vpop.permute.xlu1 %500 }
 0x196   : > { %513 = vst.msk [vmem:[%s824_s15] sm:$0xff] %vm512_vm0, %v501_v19 }
 0x1a1   : > { %v503_v20 = vpop.permute.xlu0 %502 }
 0x1a2   : > { %514 = vst.msk [vmem:[%s824_s15 + $0x8] sm:$0xff] %vm512_vm0, %v503_v20 }
 0x1a5   : > { %v505_v21 = vpop.permute.xlu1 %504  ;;  %v507_v22 = vpop.permute.xlu0 %506 }
 0x1a6   : > { %515 = vst.msk [vmem:[%s824_s15 + $0x10] sm:$0xff] %vm512_vm0, %v505_v21  ;;  %516 = vst.msk [vmem:[%s824_s15 + $0x18] sm:$0xff] %vm512_vm0, %v507_v22 }
 0x1a7 PF: > { %s11_s6 = sadd.s32 1, %s647_s6  }
 0x1a8   : > { %p8_p4 = scmp.ge.s32.totalorder %s11_s6, 6  }
 0x1aa   :  { %10 = sbr.rel (!%p8_p4) target bundleno = 1 (0x1), region = 54 }

</bundles_post_ra>
